<compile_context>
chip_gen: v7x
topology: tpu7x:2x2x1
jax: 0.10.0
libtpu: 0.0.40
codegen_flags: <defaults>
</compile_context>

<pallas_src>
import jax
import jax.numpy as jnp
from jax.experimental import pallas as pl
from jax.experimental.pallas import tpu as pltpu


def _growth_dampening_kernel(fac_ref, lg_ref, out_ref):
    """One (batch-tile, latent-tile) block.

    fac_ref : (N, HD)         cumulative dampening factors (grid-invariant)
    lg_ref  : (bt, lt, HD)    last-time-step growth rows for this block
    out_ref : (bt, lt, N, HD) dampened growth
    """
    lg = lg_ref[...]                                   # (bt, lt, HD)
    fac = fac_ref[...]                                 # (N, HD)
    # Broadcast lg over the N (sublane) axis, fac over the leading dims:
    out = lg[:, :, None, :] * fac[None, None, :, :]    # (bt, lt, N, HD)
    out_ref[...] = out.astype(out_ref.dtype)


def _largest_divisor_at_most(n, cap):
    cap = max(1, min(n, cap))
    for t in range(cap, 0, -1):
        if n % t == 0:
            return t
    return 1


def growth_dampening(growth, dampen_factor_param, *, heads, num_steps_forecast,
                     target_block_bytes=8 * 1024 * 1024):
    """Pallas-backed GrowthDampening.forward.

    growth: (B, T, L, H*Dh)
    dampen_factor_param: (heads,) raw parameter (sigmoid applied here)
    returns: (B, L, num_steps_forecast, H*Dh)
    """
    B, T, L, HD = growth.shape
    assert HD % heads == 0
    d_head = HD // heads
    N = num_steps_forecast

    # --- tiny parameter-only prep, computed exactly once (vectorized) ---
    sig = jax.nn.sigmoid(dampen_factor_param.astype(jnp.float32))        # (H,)
    powers = (jnp.arange(N, dtype=jnp.float32) + 1.0)[:, None]           # (N, 1)
    fac_h = jnp.cumsum(sig[None, :] ** powers, axis=0)                   # (N, H)
    fac = jnp.repeat(fac_h, d_head, axis=1).astype(growth.dtype)         # (N, HD)

    # --- block sizing: large VMEM-safe tiles, re-derived per problem size ---
    itemsize = jnp.dtype(growth.dtype).itemsize
    row_bytes = N * HD * itemsize                  # output bytes per (b, l) row
    lt = L
    if L * row_bytes > target_block_bytes:
        max_lt = max(1, target_block_bytes // row_bytes)
        cands = [d for d in range(1, L + 1)
                 if L % d == 0 and d <= max_lt and (d % 8 == 0 or d == L)]
        if not cands:
            cands = [d for d in range(1, L + 1) if L % d == 0 and d <= max_lt]
        lt = max(cands)
    bt = _largest_divisor_at_most(B, max(1, target_block_bytes // (lt * row_bytes)))
    # Give the second TensorCore (v7x megacore) work on small problems.
    if (B // bt) * (L // lt) == 1 and B > 1:
        bt = _largest_divisor_at_most(B, B // 2)

    grid = (B // bt, L // lt)

    out_block_bytes = bt * lt * N * HD * itemsize
    vmem_limit = int(min(max(32 * 1024 * 1024, 3 * out_block_bytes),
                         64 * 1024 * 1024))

    t_last = T - 1
    out = pl.pallas_call(
        _growth_dampening_kernel,
        out_shape=jax.ShapeDtypeStruct((B, L, N, HD), growth.dtype),
        grid=grid,
        in_specs=[
            # Grid-invariant factor table: constant index_map -> fetched once.
            pl.BlockSpec((N, HD), lambda bi, li: (0, 0)),
            # growth[:, -1] fused into the BlockSpec (T squeezed, index T-1).
            pl.BlockSpec((bt, None, lt, HD), lambda bi, li: (bi, t_last, li, 0)),
        ],
        out_specs=pl.BlockSpec((bt, lt, N, HD), lambda bi, li: (bi, li, 0, 0)),
        compiler_params=pltpu.CompilerParams(
            dimension_semantics=("parallel", "parallel"),
            vmem_limit_bytes=vmem_limit),
    )(fac, growth)
    return out


def growth_dampening_ref(growth, dampen_factor_param, *, heads, num_steps_forecast):
    """Pure-JAX reference mirroring the PyTorch module."""
    sig = jax.nn.sigmoid(dampen_factor_param)
    last_growth = growth[:, -1]                       # (B, L, HD)
    B, L, HD = last_growth.shape
    d = HD // heads
    lg5 = last_growth.reshape(B, L, 1, heads, d)
    df = sig.reshape(1, 1, 1, heads, 1)
    powers = (jnp.arange(num_steps_forecast) + 1).reshape(1, 1, num_steps_forecast, 1, 1)
    fac = jnp.cumsum(df ** powers, axis=2)
    out = lg5 * fac
    return out.reshape(B, L, num_steps_forecast, HD)


if __name__ == "__main__":
    B, T, L = 2, 8, 4
    heads, d_head = 8, 4
    HD = heads * d_head
    N = 6

    key = jax.random.PRNGKey(0)
    k_growth, k_param = jax.random.split(key)
    growth = jax.random.normal(k_growth, (B, T, L, HD), dtype=jnp.float32)
    dampen_factor_param = jax.random.normal(k_param, (heads,), dtype=jnp.float32)

    out = growth_dampening(growth, dampen_factor_param,
                           heads=heads, num_steps_forecast=N)
    out = jax.block_until_ready(out)

    ref = growth_dampening_ref(growth, dampen_factor_param,
                               heads=heads, num_steps_forecast=N)
    assert out.shape == (B, L, N, HD)
    assert jnp.allclose(out, ref, atol=1e-5, rtol=1e-5)

    print("KERNEL_OK")
</pallas_src>

<mosaic_0001>
module attributes {stable_mosaic.version = 11 : i64} {
  func.func @_growth_dampening_kernel(%arg0: i32, %arg1: i32, %arg2: memref<6x32xf32, #tpu.memory_space<vmem>>, %arg3: memref<1x1x4x32xf32, #tpu.memory_space<vmem>>, %arg4: memref<1x4x6x32xf32, #tpu.memory_space<vmem>>) attributes {dimension_semantics = [#tpu.dimension_semantics<parallel>, #tpu.dimension_semantics<parallel>], iteration_bounds = array<i64: 2, 1>, scalar_prefetch = 0 : i64, scratch_operands = 0 : i64, tpu.core_type = #tpu.core_type<tc>, window_params = [{pipeline_mode = #tpu.pipeline_mode<synchronous>, transform_indices = @transform_0, window_bounds = array<i64: 6, 32>}, {transform_indices = @transform_1, window_bounds = array<i64: 1, 1, 4, 32>}, {transform_indices = @transform_2, window_bounds = array<i64: 1, 4, 6, 32>}]} {
    %c0 = arith.constant 0 : index
    %c0_0 = arith.constant 0 : index
    %c0_1 = arith.constant 0 : index
    %c0_2 = arith.constant 0 : index
    %0 = vector.load %arg3[%c0, %c0_0, %c0_1, %c0_2] : memref<1x1x4x32xf32, #tpu.memory_space<vmem>>, vector<1x1x4x32xf32>
    %1 = vector.shape_cast %0 : vector<1x1x4x32xf32> to vector<1x4x32xf32>
    %c0_3 = arith.constant 0 : index
    %c0_4 = arith.constant 0 : index
    %2 = vector.load %arg2[%c0_3, %c0_4] : memref<6x32xf32, #tpu.memory_space<vmem>>, vector<6x32xf32>
    %3 = vector.shape_cast %1 : vector<1x4x32xf32> to vector<1x4x1x32xf32>
    %4 = vector.shape_cast %2 : vector<6x32xf32> to vector<1x1x6x32xf32>
    %5 = vector.broadcast %3 : vector<1x4x1x32xf32> to vector<1x4x6x32xf32>
    %6 = vector.broadcast %4 : vector<1x1x6x32xf32> to vector<1x4x6x32xf32>
    %7 = arith.mulf %5, %6 : vector<1x4x6x32xf32>
    %c0_5 = arith.constant 0 : index
    %c0_6 = arith.constant 0 : index
    %c0_7 = arith.constant 0 : index
    %c0_8 = arith.constant 0 : index
    %8 = vector.load %arg4[%c0_5, %c0_6, %c0_7, %c0_8] : memref<1x4x6x32xf32, #tpu.memory_space<vmem>>, vector<1x4x6x32xf32>
    tpu.vector_store %arg4[%c0_5, %c0_6, %c0_7, %c0_8], %7 {strides = array<i32>} : memref<1x4x6x32xf32, #tpu.memory_space<vmem>>, vector<1x4x6x32xf32>,
    return
  }
  func.func @transform_0(%arg0: i32, %arg1: i32) -> (i32, i32) {
    %c0_i32 = arith.constant 0 : i32
    %c0_i32_0 = arith.constant 0 : i32
    %c0_i32_1 = arith.constant 0 : i32
    return %c0_i32, %c0_i32_0 : i32, i32
  }
  func.func @transform_1(%arg0: i32, %arg1: i32) -> (i32, i32, i32, i32) {
    %c7_i32 = arith.constant 7 : i32
    %c0_i32 = arith.constant 0 : i32
    %c0_i32_0 = arith.constant 0 : i32
    return %arg0, %c7_i32, %arg1, %c0_i32 : i32, i32, i32, i32
  }
  func.func @transform_2(%arg0: i32, %arg1: i32) -> (i32, i32, i32, i32) {
    %c0_i32 = arith.constant 0 : i32
    %c0_i32_0 = arith.constant 0 : i32
    %c0_i32_1 = arith.constant 0 : i32
    return %arg0, %arg1, %c0_i32, %c0_i32_0 : i32, i32, i32, i32
  }
}

</mosaic_0001>

<bundles_post_ra>
// kernel: tpu_custom_call.1
= control target key start
LH: loop header
LB: loop body
LE: loop exit
PB: predicated region body
PF: predicated region fallthrough
CT: control target
= control target key end

     0   :  { %7 = vsyncpa [#allocation3], 0  ;;  %s745_s0 = inlined_call_operand.hbm [shape: f32[6,32], index: 0, kind: input, shape index: {}]   ;;  %s746_s1 = inlined_call_operand.hbm [shape: f32[2,8,4,32], index: 1, kind: input, shape index: {}]   ;;  %s747_s2 = inlined_call_operand.vmem [shape: f32[2,4,6,32], index: 2, kind: output, shape index: {}]  }
   0x1   :  { %8 = vsyncpa [#allocation5], 0 }
   0x2   :  { %10 = vsyncpa [#allocation5 + $0x1], 0  ;;  %s583_s9 = smov 0   ;;  %s585_s10 = smov 0  }
   0x3   :  { %s587_s11 = smov 0   ;;  %s589_s12 = smov 0  }
   0x4   :  { %s591_s13 = smov 0   ;;  %s593_s14 = smov 0  }
   0x5 LB: > { %s365_s15 = sadd.s32 4294967295, %s563_s14   ;;  %p71_p0 = scmp.ne.s32.totalorder %s547_s10, %s543_s9  ;;  %s563_s14 = sphi %s593_s14, %s16_s14   ;;  %s559_s13 = sphi %s591_s13, %s766_s13   ;;  %s555_s12 = sphi %s589_s12, %s765_s12   ;;  %s551_s11 = sphi %s587_s11, %s764_s11   ;;  %s547_s10 = sphi %s585_s10, %s763_s10   ;;  %s543_s9 = sphi %s583_s9, %s762_s9  }
   0x6   : > { %p613_p1 = scmp.eq.s32.totalorder %s365_s15, 0  ;;  %p367_p2 = scmp.ge.s32.totalorder %s563_s14, 1 }
   0x7   : > { %p110_p3 = scmp.lt.s32.totalorder %s563_s14, 3  ;;  %s565_s19 = smov [#allocation2]  }
   0x8   : > { %s752_s16 = scalar_select %p613_p1, 1, 0 }
   0x9   : > { %p621_p4 = por %p613_p1, %p71_p0  ;;  %p625_p5 = pnand %p367_p2, %p110_p3 }
   0xa   : > { %s123_s20 = sshll.u32 %s565_s19, 4  ;;  %s28_s22 = sadd.s32 1, %s559_s13  ;;  %s124_s20 = int_to_ptr.vmem [resolvable:$true] %s123_s20 }
   0xb   : > { %s753_s17 = scalar_select %p621_p4, 1, 0 }
   0xc   : > { %s754_s18 = scalar_select %p625_p5, 1, 0 }
   0xd   : > { %p389_p6 = pneg %p625_p5  ;;  %s58_s23 = sadd.s32 1, %s551_s11 }
   0xe   : > { %p639_p8 = scmp.ge.s32.totalorder %s28_s22, 2  ;;  %s450_s27 = scalar_lea.hbm %s745_s0, 128 }
   0xf   : > { %p633_p7 = pnand %p389_p6, %p613_p1  ;;  %p451_p9 = scmp.ne.s32.totalorder %s745_s0, %s450_s27 }
  0x10   : > { %s756_s24 = scalar_select %p639_p8, 1, 0 }
  0x11   : > { %p452_p10 = pneg %p633_p7  ;;  %p457_p13 = scmp.lt.u32.totalorder %s450_s27, %s745_s0 }
  0x13   : > { %p453_p11 = pnand %p452_p10, %p451_p9 }
  0x15   : > { %p454_p12 = pneg %p453_p11 }
  0x17   : > { %p459_p0 = pnand %p457_p13, %p454_p12 }
  0x19   : > { %462 = shalt.err (!%p459_p0)
}
  0x1a   : > { %s463_s4 = scalar_lea.vmem %s124_s20, 128  ;;  %p471_p4 = scmp.lt.s32.totalorder %s124_s20, %s124_s20 }
  0x1b   : > { %p464_p2 = scmp.ne.s32.totalorder %s124_s20, %s463_s4  ;;  %p472_p1 = scmp.lt.s32.totalorder %s463_s4, %s463_s4 }
  0x1d   : > { %p466_p3 = pnand %p464_p2, %p452_p10  ;;  %p473_p5 = por %p472_p1, %p471_p4 }
  0x1f   : > { %p467_p6 = pneg %p466_p3 }
  0x21   : > { %p474_p8 = pnand %p473_p5, %p467_p6 }
  0x23   : > { %477 = shalt.err (!%p474_p8)
}
  0x24   : > { %392 = dma.hbm_to_vmem [thread:$0]  (!%p633_p7), %s745_s0, 128, %s124_s20, [#allocation3]  }
  0x25   : > { %p757_p9 = scmp.ne.s32.totalorder %s756_s24, 0  ;;  %p65_p1 = scmp.ne.s32.totalorder %s551_s11, %s547_s10 }
  0x26   : > { %p66_p4 = scmp.eq.s32.totalorder %s563_s14, 0  ;;  %p398_p5 = scmp.lt.s32.totalorder %s563_s14, 2 }
  0x27   : > { %s768_s22 = smov (%p757_p9, %s28_s22), 0  ;;  %s134_s8 = sand.u32 1, %s551_s11  }
  0x28   : > { %s53_s7 = ssub.s32 %s559_s13, %s768_s22  ;;  %p67_p10 = por %p66_p4, %p65_p1 }
  0x29   : > { %p56_p8 = scmp.eq.s32.totalorder %s53_s7, 0  ;;  %s381_s9 = sshll.u32 %s559_s13, 9 }
  0x2a   : > { %s370_s19 = sshll.u32 %s134_s8, 2  ;;  %s300_s20 = scalar_lea.hbm %s746_s1, %s381_s9 }
  0x2b   : > { %s674_s15 = scalar_select %p56_p8, %s551_s11, %s58_s23  }
  0x2c   : > { %s679_s24 = scalar_lea.hbm %s300_s20, 448  ;;  %s138_s26 = scalar_lea.vmem [#allocation4], %s370_s19 }
  0x2d   : > { %s148_s27 = sshll.u32 %s138_s26, 4  ;;  %p683_p7 = pnand %p398_p5, %p67_p10  ;;  %s681_s27 = int_to_ptr.vmem [resolvable:$true] %s148_s27 }
  0x2e   : > { %s135_s23 = scalar_lea.sflag [#allocation5], %s134_s8  ;;  %s508_s29 = scalar_lea.hbm %s300_s20, 512 }
  0x2f   : > { %p479_p11 = scmp.ne.s32.totalorder %s679_s24, %s508_s29  ;;  %p480_p12 = pneg %p683_p7 }
  0x30   : > { %s483_s4 = scalar_lea.hbm %s746_s1, 1024  ;;  %p484_p2 = scmp.lt.u32.totalorder %s679_s24, %s746_s1 }
  0x31   : > { %p481_p13 = pnand %p480_p12, %p479_p11  ;;  %p485_p3 = scmp.lt.u32.totalorder %s483_s4, %s508_s29 }
  0x32   : > { %p487_p9 = scmp.lt.u32.totalorder %s508_s29, %s679_s24 }
  0x33   : > { %p482_p0 = pneg %p481_p13  ;;  %p486_p6 = por %p485_p3, %p484_p2 }
  0x35   : > { %p488_p1 = por %p487_p9, %p486_p6 }
  0x37   : > { %p489_p4 = pnand %p488_p1, %p482_p0 }
  0x39   : > { %492 = shalt.err (!%p489_p4)
}
  0x3a   : > { %s493_s7 = scalar_lea.vmem %s681_s27, 64  ;;  %s566_s8 = smov [#allocation4]  }
  0x3b   : > { %p494_p5 = scmp.ne.s32.totalorder %s681_s27, %s493_s7  ;;  %s498_s9 = sshll.u32 %s566_s8, 4  ;;  %s499_s9 = int_to_ptr.vmem [resolvable:$false] %s498_s9 }
  0x3c   : > { %s500_s19 = scalar_lea.vmem %s499_s9, 128  ;;  %p501_p11 = scmp.lt.s32.totalorder %s681_s27, %s499_s9 }
  0x3d   : > { %p496_p8 = pnand %p494_p5, %p480_p12  ;;  %p502_p13 = scmp.lt.s32.totalorder %s500_s19, %s493_s7 }
  0x3f   : > { %p497_p10 = pneg %p496_p8  ;;  %p503_p2 = por %p502_p13, %p501_p11 }
  0x41   : > { %p504_p3 = pnand %p503_p2, %p497_p10 }
  0x43   : > { %507 = shalt.err (!%p504_p3)
}
  0x44   : > { %396 = dma.hbm_to_vmem [thread:$0]  (!%p683_p7), %s679_s24, 64, %s681_s27, %s135_s23  }
  0x45   : > { %p759_p0 = scmp.ne.s32.totalorder %s754_s18, 0 }
  0x46   : > { %p760_p12 = scmp.ne.s32.totalorder (!%p759_p0), %s752_s16, 0 }
  0x47   : > { %157 = sbr.rel (%p759_p0) target bundleno = 99 (0x63), region = 28 }
  0x4e   : > { %534 = dma.done.wait (%p760_p12), [#allocation3], 128  }
  0x4f   : > { %536 = vsyncadd (%p760_p12), [#allocation3], 4294967168  ;;  %s163_s21 = sand.u32 1, %s547_s10   ;;  %p761_p6 = scmp.ne.s32.totalorder %s753_s17, 0 }
  0x50   : > { %s375_s25 = sshll.u32 %s163_s21, 2  ;;  %s164_s20 = scalar_lea.sflag [#allocation5], %s163_s21 }
  0x51   : > { %s167_s26 = scalar_lea.vmem [#allocation4], %s375_s25 }
  0x52   : > { %538 = dma.done.wait (%p761_p6), %s164_s20, 64  }
  0x53   : > { %540 = vsyncadd (%p761_p6), %s164_s20, 4294967232  ;;  %p193_p7 = scmp.lt.s32.totalorder %s555_s12, 1  ;;  %v216_v0 = vlaneseq  ;;  %v567_v1 = vmov 1966171168   ;;  %v203_v10 = vld [vmem:[#allocation2] sm:$0x3f] }
  0x54   : > { %v214_v2 = vunpack.c.l.s4 %v567_v1  ;;  %v378_v7 = vld.sshfl [vmem:[%s167_s26] sm:$0x33 pattern:$0x75316420]  ;;  %vm253_vm0 = vcmask 259072  }
  0x55   : > { %v217_v3 = vshrl.u32 %v216_v0, 7  ;;  %s770_s12 = smov (!%p193_p7, %s555_s12), 1  ;;  %v212_v9 = vcombine.high %v378_v7, %v378_v7 }
  0x56   : > { %v215_v4 = vunpack.c.0.s8 %v214_v2  ;;  %s382_s16 = sshll.u32 %s770_s12, 5 }
  0x57   : > { %v231_v6 = vsub.s32 0, %v217_v3  ;;  %s200_s24 = scalar_lea.vmem %s747_s2, %s382_s16 }
  0x58   : > { %v218_v5 = vsub.s32 %v215_v4, %v217_v3 }
  0x5a   : > { %v219_v8 = vrot.slane %v378_v7, %v218_v5  ;;  %v226_v12 = vrot.slane %v212_v9, %v218_v5 }
  0x5c   : > { %v232_v11 = vrot.slane %v219_v8, %v231_v6  ;;  %v227_v13 = vcombine.high %v219_v8, %v219_v8  ;;  %v236_v15 = vrot.slane %v226_v12, %v231_v6  ;;  %v228_v17 = vcombine.high %v226_v12, %v226_v12 }
  0x5e   : > { %v249_v14 = vmul.f32 %v232_v11, %v203_v10  ;;  %v240_v16 = vrot.slane %v227_v13, %v231_v6  ;;  %v250_v18 = vmul.f32 %v236_v15, %v203_v10  ;;  %v244_v20 = vrot.slane %v228_v17, %v231_v6 }
  0x60   : > { %254 = vst.msk [vmem:[%s200_s24] sm:$0x3f] %vm253_vm0, %v249_v14  ;;  %v251_v19 = vmul.f32 %v240_v16, %v203_v10  ;;  %255 = vst.msk [vmem:[%s200_s24 + $0x8] sm:$0x3f] %vm253_vm0, %v250_v18  ;;  %v252_v21 = vmul.f32 %v244_v20, %v203_v10 }
  0x62   : > { %256 = vst.msk [vmem:[%s200_s24 + $0x10] sm:$0x3f] %vm253_vm0, %v251_v19  ;;  %257 = vst.msk [vmem:[%s200_s24 + $0x18] sm:$0x3f] %vm253_vm0, %v252_v21 }
  0x63 PF: > { %s16_s14 = sadd.s32 1, %s563_s14   ;;  %s762_s9 = smov %s547_s10 }
  0x64   : > { %p13_p9 = scmp.ge.s32.totalorder %s16_s14, 4   ;;  %s763_s10 = smov %s551_s11 }
  0x65   : > { %s764_s11 = smov %s674_s15  ;;  %s765_s12 = smov %s559_s13 }
  0x66   : > { %s766_s13 = smov %s768_s22  ;;  %15 = sbr.rel (!%p13_p9) target bundleno = 5 (0x5), region = 73 }
  0x6d   :  { %288 = vsyncpa [#allocation3], 1 }
  0x6e   :  { %290 = vsyncpa [#allocation3 + $0x1], 1 }
  0x6f   :  { %291 = vsyncpa [#allocation5], 1 }
  0x70   :  { %293 = vsyncpa [#allocation5 + $0x1], 1 }

</bundles_post_ra>
